<compile_context>
chip_gen: v6e
topology: v6e:2x2x1
jax: 0.10.0
libtpu: 0.0.40
codegen_flags: <defaults>
</compile_context>

<pallas_src>
import functools

import jax
import jax.numpy as jnp
from jax import lax
from jax.experimental import pallas as pl
from jax.experimental.pallas import tpu as pltpu


def _round_up(x, m):
    return (x + m - 1) // m * m


# --------------------------------------------------------------------------
# Kernel
# --------------------------------------------------------------------------
def residual_kernel(x_ref, mask_ref, w1_ref, w2_ref, o_ref, xpad_ref, h_ref,
                    *, W, P):
    """One grid step: bb samples of  x + Conv1x1(ReLU(Conv3x3(ReLU(x))))."""
    # x_ref    : (bb, Cin, H*W)    raw input block (lane-dense; skip source)
    # mask_ref : (2, H*W)          [0]: zero col W-1 (kx==0 copy), [1]: zero col 0 (kx==2 copy)
    # w1_ref   : (3, Cres, 3*Cin)  ky-major 3x3 weights, K index = kx*Cin + cin
    # w2_ref   : (Cout, Cres)      1x1 weights
    # o_ref    : (bb, Cout, H*W)
    # xpad_ref : (bb, 3*Cin, L)    scratch: 3 masked+shifted ReLU(x) copies with halos
    # h_ref    : (Cres, bb*H*W)    scratch: ReLU(conv3x3) for the hoisted 1x1 dot
    bb, Cin, HW = x_ref.shape
    Cres = w2_ref.shape[1]
    L = xpad_ref.shape[-1]

    # ---- build the three pre-masked, pre-shifted ReLU(x) copies -------------
    # Zero only the readable halo regions: [0, P) is one aligned 128-lane chunk
    # per row; the right tail is W+3 lanes.  Interiors are written right after
    # (in program order) and overwrite the 0..2 overlapping lanes.
    xpad_ref[:, :, :P] = jnp.zeros((bb, 3 * Cin, P), xpad_ref.dtype)
    xpad_ref[:, :, P + HW - 2:] = jnp.zeros(
        (bb, 3 * Cin, L - (P + HW - 2)), xpad_ref.dtype)

    m_l = mask_ref[0:1, :]          # (1, HW): zeros last-column pixels
    m_r = mask_ref[1:2, :]          # (1, HW): zeros first-column pixels

    for b in range(bb):             # bb is small & static (unrolled)
        r = jnp.maximum(x_ref[b], 0.0)                                 # ReLU once
        # group 0 (kx==0 taps): interior at P      (128-lane aligned store)
        xpad_ref[b, 0 * Cin:1 * Cin, P:P + HW] = (r * m_l).astype(xpad_ref.dtype)
        # group 1 (kx==1 taps): interior at P-1
        xpad_ref[b, 1 * Cin:2 * Cin, P - 1:P - 1 + HW] = r.astype(xpad_ref.dtype)
        # group 2 (kx==2 taps): interior at P-2
        xpad_ref[b, 2 * Cin:3 * Cin, P - 2:P - 2 + HW] = (r * m_r).astype(xpad_ref.dtype)

    # ---- 3x3 conv: 3 fused dots per sample, K = 3*Cin -----------------------
    for b in range(bb):
        acc = jnp.zeros((Cres, HW), jnp.float32)
        for ky in range(3):
            t = P - (W + 1) + ky * W                 # static window offset
            win = xpad_ref[b, :, t:t + HW]           # (3*Cin, HW) contiguous read
            acc = acc + jnp.dot(w1_ref[ky], win,
                                preferred_element_type=jnp.float32)
        h_ref[:, b * HW:(b + 1) * HW] = jnp.maximum(acc, 0.0).astype(h_ref.dtype)

    # ---- 1x1 conv hoisted: one (Cout,Cres) x (Cres, bb*HW) dot --------------
    res = jnp.dot(w2_ref[...], h_ref[...], preferred_element_type=jnp.float32)
    # skip-add + store, per sample (x re-read here -> no long-lived block value)
    for b in range(bb):
        o_ref[b] = (x_ref[b].astype(jnp.float32)
                    + res[:, b * HW:(b + 1) * HW]).astype(o_ref.dtype)


# --------------------------------------------------------------------------
# Hardware-aware helpers
# --------------------------------------------------------------------------
def _device_kind():
    try:
        return jax.devices()[0].device_kind.lower()
    except Exception:
        return ""


def _mxu_prefers_bf16():
    """bf16 MXU operands (f32 accumulate) are a clear win on v6e/v7x."""
    kind = _device_kind()
    return any(tag in kind for tag in ("v6", "v7", "7x"))


def _tensorcores_per_chip():
    """Best effort: v7x (and megacore v4/v5p) expose 2 schedulable cores."""
    kind = _device_kind()
    if any(tag in kind for tag in ("v7", "7x", "v4", "v5p")):
        return 2
    return 1


def _tpu_vmem_capacity_bytes(default=64 * 1024 * 1024):
    try:
        cap = getattr(pltpu.get_tpu_info(), "vmem_capacity_bytes", None)
        if cap:
            return int(cap)
    except Exception:
        pass
    return default


def _const_block_spec(shape):
    """Constant-per-grid blocks: single-buffer them when supported (saves VMEM,
    matters most under v7x's 64 MiB budget)."""
    index_map = lambda i, _n=len(shape): (0,) * _n
    try:
        return pl.BlockSpec(shape, index_map, pipeline_mode=pl.Buffered(1))
    except Exception:
        return pl.BlockSpec(shape, index_map)


def _pick_block_batch(batch, per_sample_bytes, *, target_bytes=2 * 1024 * 1024,
                      max_bb=16, min_steps=1):
    """Largest divisor of `batch` (<= max_bb) whose in+out block stays under
    target_bytes; keeps >= min_steps grid steps (megacore) when possible."""
    limit = min(batch, max_bb)
    if min_steps > 1:
        limit = min(limit, max(batch // min_steps, 1))
    best = 1
    for bb in range(1, max(limit, 1) + 1):
        if batch % bb == 0 and bb * per_sample_bytes <= target_bytes:
            best = bb
    return best


# --------------------------------------------------------------------------
# Wrapper
# --------------------------------------------------------------------------
def residual_layer(x_nchw, w3x3_oihw, w1x1_oihw, *, use_bf16=None):
    """x_nchw: (B, Cin, H, W) float32.  Weights in PyTorch OIHW layout."""
    B, Cin, H, W = x_nchw.shape
    Cres = w3x3_oihw.shape[0]
    Cout = w1x1_oihw.shape[0]
    assert Cout == Cin, "residual add requires h_dim == in_dim"
    assert w3x3_oihw.shape == (Cres, Cin, 3, 3)
    assert w1x1_oihw.shape == (Cout, Cres, 1, 1)

    if use_bf16 is None:
        use_bf16 = _mxu_prefers_bf16()
    compute_dtype = jnp.bfloat16 if use_bf16 else x_nchw.dtype

    HW = H * W
    P = _round_up(W + 1, 128)           # lane-aligned left halo
    L = P + HW + (W + 1)                # + right halo

    # Weight repack (tiny, done once):
    #   3x3: OIHW -> (kh, O, kw, I) -> (3, Cres, 3*Cin)  (K index = kx*Cin + i)
    w1f = jnp.transpose(w3x3_oihw, (2, 0, 3, 1)).reshape(3, Cres, 3 * Cin)
    w1f = w1f.astype(compute_dtype)
    w2 = w1x1_oihw[:, :, 0, 0].astype(compute_dtype)           # (Cout, Cres)

    # Interior wrap-around masks (halo slots are zeroed in-kernel):
    #   mask[0]: zero last-column pixels (used by the kx==0 copy)
    #   mask[1]: zero first-column pixels (used by the kx==2 copy)
    col = jnp.arange(HW) % W
    mask = jnp.stack([jnp.where(col == W - 1, 0.0, 1.0),
                      jnp.where(col == 0, 0.0, 1.0)]).astype(compute_dtype)

    # Collapse H*W onto the minor (lane) dim; contiguous reshape, no copy.
    x2 = x_nchw.reshape(B, Cin, HW)

    xsize = jnp.dtype(x_nchw.dtype).itemsize
    csize = jnp.dtype(compute_dtype).itemsize

    n_tc = _tensorcores_per_chip()
    bb = _pick_block_batch(
        B, (Cin + Cout) * HW * xsize,
        target_bytes=2 * 1024 * 1024, max_bb=16,
        min_steps=n_tc if B >= n_tc else 1)
    grid = (B // bb,)

    # Shape-aware VMEM budget (double-buffered x/o blocks, single-buffered
    # constants, scratch, big f32 temporaries), clamped by the chip's capacity.
    est = (2 * bb * (Cin + Cout) * HW * xsize
           + (w1f.size + w2.size + mask.size) * csize
           + bb * 3 * Cin * L * csize
           + Cres * bb * HW * csize
           + (Cout * bb * HW + Cres * HW + 4 * Cin * HW) * 4)
    vmem_cap = _tpu_vmem_capacity_bytes()
    vmem_limit = int(min(max(2 * est, 16 * 1024 * 1024), int(0.9 * vmem_cap)))

    out = pl.pallas_call(
        functools.partial(residual_kernel, W=W, P=P),
        out_shape=jax.ShapeDtypeStruct((B, Cout, HW), x_nchw.dtype),
        grid_spec=pltpu.PrefetchScalarGridSpec(
            num_scalar_prefetch=0,
            grid=grid,
            in_specs=[
                pl.BlockSpec((bb, Cin, HW), lambda i: (i, 0, 0)),
                _const_block_spec((2, HW)),
                _const_block_spec((3, Cres, 3 * Cin)),
                _const_block_spec((Cout, Cres)),
            ],
            out_specs=pl.BlockSpec((bb, Cout, HW), lambda i: (i, 0, 0)),
            scratch_shapes=[
                pltpu.VMEM((bb, 3 * Cin, L), compute_dtype),   # padded copies
                pltpu.VMEM((Cres, bb * HW), compute_dtype),    # hidden activations
            ],
        ),
        compiler_params=pltpu.CompilerParams(
            dimension_semantics=("parallel",),
            vmem_limit_bytes=vmem_limit,
        ),
    )(x2, mask, w1f, w2)

    return out.reshape(B, Cout, H, W)


# --------------------------------------------------------------------------
# Pure-JAX reference (mirrors the PyTorch module)
# --------------------------------------------------------------------------
def residual_layer_ref(x_nchw, w3x3_oihw, w1x1_oihw):
    h = jnp.maximum(x_nchw, 0.0)
    h = lax.conv_general_dilated(h, w3x3_oihw, (1, 1), ((1, 1), (1, 1)),
                                 dimension_numbers=("NCHW", "OIHW", "NCHW"))
    h = jnp.maximum(h, 0.0)
    h = lax.conv_general_dilated(h, w1x1_oihw, (1, 1), ((0, 0), (0, 0)),
                                 dimension_numbers=("NCHW", "OIHW", "NCHW"))
    return x_nchw + h


if __name__ == "__main__":
    # Small shapes consistent with the module: in_dim == h_dim for the residual add.
    B, H, W = 2, 16, 16
    in_dim, h_dim, res_h_dim = 4, 4, 8

    key = jax.random.PRNGKey(0)
    kx, kw1, kw2 = jax.random.split(key, 3)

    x = jax.random.normal(kx, (B, in_dim, H, W), dtype=jnp.float32)
    w3x3 = 0.1 * jax.random.normal(kw1, (res_h_dim, in_dim, 3, 3), dtype=jnp.float32)
    w1x1 = 0.1 * jax.random.normal(kw2, (h_dim, res_h_dim, 1, 1), dtype=jnp.float32)

    # f32 compute for the demo so the correctness check stays tight
    # (use_bf16=None auto-enables bf16 MXU operands on v6e/v7x in real use).
    out = jax.block_until_ready(residual_layer(x, w3x3, w1x1, use_bf16=False))
    ref = jax.block_until_ready(residual_layer_ref(x, w3x3, w1x1))

    assert out.shape == (B, h_dim, H, W)
    assert jnp.allclose(out, ref, atol=1e-4, rtol=1e-4), "mismatch vs reference"

    print("KERNEL_OK")
</pallas_src>

<mosaic_0001>
module attributes {stable_mosaic.version = 11 : i64} {
  func.func @residual_kernel(%arg0: i32, %arg1: memref<2x4x256xf32, #tpu.memory_space<vmem>>, %arg2: memref<2x256xf32, #tpu.memory_space<vmem>>, %arg3: memref<3x8x12xf32, #tpu.memory_space<vmem>>, %arg4: memref<4x8xf32, #tpu.memory_space<vmem>>, %arg5: memref<2x4x256xf32, #tpu.memory_space<vmem>>, %arg6: memref<2x12x401xf32, #tpu.memory_space<vmem>>, %arg7: memref<8x512xf32, #tpu.memory_space<vmem>>) attributes {dimension_semantics = [#tpu.dimension_semantics<parallel>], iteration_bounds = array<i64: 1>, scalar_prefetch = 0 : i64, scratch_operands = 2 : i64, tpu.core_type = #tpu.core_type<tc>, window_params = [{transform_indices = @transform_0, window_bounds = array<i64: 2, 4, 256>}, {pipeline_mode = #tpu.pipeline_mode<synchronous>, transform_indices = @transform_1, window_bounds = array<i64: 2, 256>}, {pipeline_mode = #tpu.pipeline_mode<synchronous>, transform_indices = @transform_2, window_bounds = array<i64: 3, 8, 12>}, {pipeline_mode = #tpu.pipeline_mode<synchronous>, transform_indices = @transform_3, window_bounds = array<i64: 4, 8>}, {transform_indices = @transform_4, window_bounds = array<i64: 2, 4, 256>}]} {
    %cst = arith.constant 0.000000e+00 : f32
    %0 = vector.broadcast %cst : f32 to vector<2x12x128xf32>
    %c0 = arith.constant 0 : index
    %c0_0 = arith.constant 0 : index
    %c0_1 = arith.constant 0 : index
    %1 = vector.load %arg6[%c0, %c0_0, %c0_1] : memref<2x12x401xf32, #tpu.memory_space<vmem>>, vector<2x12x128xf32>
    tpu.vector_store %arg6[%c0, %c0_0, %c0_1], %0 {strides = array<i32>} : memref<2x12x401xf32, #tpu.memory_space<vmem>>, vector<2x12x128xf32>,
    %cst_2 = arith.constant 0.000000e+00 : f32
    %2 = vector.broadcast %cst_2 : f32 to vector<2x12x19xf32>
    %c0_3 = arith.constant 0 : index
    %c0_4 = arith.constant 0 : index
    %c382 = arith.constant 382 : index
    %3 = vector.load %arg6[%c0_3, %c0_4, %c382] : memref<2x12x401xf32, #tpu.memory_space<vmem>>, vector<2x12x19xf32>
    tpu.vector_store %arg6[%c0_3, %c0_4, %c382], %2 {strides = array<i32>} : memref<2x12x401xf32, #tpu.memory_space<vmem>>, vector<2x12x19xf32>,
    %c0_5 = arith.constant 0 : index
    %c0_6 = arith.constant 0 : index
    %4 = vector.load %arg2[%c0_5, %c0_6] : memref<2x256xf32, #tpu.memory_space<vmem>>, vector<1x256xf32>
    %c1 = arith.constant 1 : index
    %c0_7 = arith.constant 0 : index
    %5 = vector.load %arg2[%c1, %c0_7] : memref<2x256xf32, #tpu.memory_space<vmem>>, vector<1x256xf32>
    %c0_8 = arith.constant 0 : index
    %c0_9 = arith.constant 0 : index
    %c0_10 = arith.constant 0 : index
    %6 = vector.load %arg1[%c0_8, %c0_9, %c0_10] : memref<2x4x256xf32, #tpu.memory_space<vmem>>, vector<1x4x256xf32>
    %7 = vector.shape_cast %6 : vector<1x4x256xf32> to vector<4x256xf32>
    %cst_11 = arith.constant 0.000000e+00 : f32
    %8 = vector.broadcast %cst_11 : f32 to vector<4x256xf32>
    %9 = arith.maximumf %7, %8 : vector<4x256xf32>
    %10 = vector.broadcast %4 : vector<1x256xf32> to vector<4x256xf32>
    %11 = arith.mulf %9, %10 : vector<4x256xf32>
    %c0_12 = arith.constant 0 : index
    %c0_13 = arith.constant 0 : index
    %c128 = arith.constant 128 : index
    %12 = vector.load %arg6[%c0_12, %c0_13, %c128] : memref<2x12x401xf32, #tpu.memory_space<vmem>>, vector<1x4x256xf32>
    %13 = vector.shape_cast %12 : vector<1x4x256xf32> to vector<4x256xf32>
    %14 = vector.shape_cast %11 : vector<4x256xf32> to vector<1x4x256xf32>
    tpu.vector_store %arg6[%c0_12, %c0_13, %c128], %14 {strides = array<i32>} : memref<2x12x401xf32, #tpu.memory_space<vmem>>, vector<1x4x256xf32>,
    %c0_14 = arith.constant 0 : index
    %c4 = arith.constant 4 : index
    %c127 = arith.constant 127 : index
    %15 = vector.load %arg6[%c0_14, %c4, %c127] : memref<2x12x401xf32, #tpu.memory_space<vmem>>, vector<1x4x256xf32>
    %16 = vector.shape_cast %15 : vector<1x4x256xf32> to vector<4x256xf32>
    %17 = vector.shape_cast %9 : vector<4x256xf32> to vector<1x4x256xf32>
    tpu.vector_store %arg6[%c0_14, %c4, %c127], %17 {strides = array<i32>} : memref<2x12x401xf32, #tpu.memory_space<vmem>>, vector<1x4x256xf32>,
    %18 = vector.broadcast %5 : vector<1x256xf32> to vector<4x256xf32>
    %19 = arith.mulf %9, %18 : vector<4x256xf32>
    %c0_15 = arith.constant 0 : index
    %c8 = arith.constant 8 : index
    %c126 = arith.constant 126 : index
    %20 = vector.load %arg6[%c0_15, %c8, %c126] : memref<2x12x401xf32, #tpu.memory_space<vmem>>, vector<1x4x256xf32>
    %21 = vector.shape_cast %20 : vector<1x4x256xf32> to vector<4x256xf32>
    %22 = vector.shape_cast %19 : vector<4x256xf32> to vector<1x4x256xf32>
    tpu.vector_store %arg6[%c0_15, %c8, %c126], %22 {strides = array<i32>} : memref<2x12x401xf32, #tpu.memory_space<vmem>>, vector<1x4x256xf32>,
    %c1_16 = arith.constant 1 : index
    %c0_17 = arith.constant 0 : index
    %c0_18 = arith.constant 0 : index
    %23 = vector.load %arg1[%c1_16, %c0_17, %c0_18] : memref<2x4x256xf32, #tpu.memory_space<vmem>>, vector<1x4x256xf32>
    %24 = vector.shape_cast %23 : vector<1x4x256xf32> to vector<4x256xf32>
    %cst_19 = arith.constant 0.000000e+00 : f32
    %25 = vector.broadcast %cst_19 : f32 to vector<4x256xf32>
    %26 = arith.maximumf %24, %25 : vector<4x256xf32>
    %27 = vector.broadcast %4 : vector<1x256xf32> to vector<4x256xf32>
    %28 = arith.mulf %26, %27 : vector<4x256xf32>
    %c1_20 = arith.constant 1 : index
    %c0_21 = arith.constant 0 : index
    %c128_22 = arith.constant 128 : index
    %29 = vector.load %arg6[%c1_20, %c0_21, %c128_22] : memref<2x12x401xf32, #tpu.memory_space<vmem>>, vector<1x4x256xf32>
    %30 = vector.shape_cast %29 : vector<1x4x256xf32> to vector<4x256xf32>
    %31 = vector.shape_cast %28 : vector<4x256xf32> to vector<1x4x256xf32>
    tpu.vector_store %arg6[%c1_20, %c0_21, %c128_22], %31 {strides = array<i32>} : memref<2x12x401xf32, #tpu.memory_space<vmem>>, vector<1x4x256xf32>,
    %c1_23 = arith.constant 1 : index
    %c4_24 = arith.constant 4 : index
    %c127_25 = arith.constant 127 : index
    %32 = vector.load %arg6[%c1_23, %c4_24, %c127_25] : memref<2x12x401xf32, #tpu.memory_space<vmem>>, vector<1x4x256xf32>
    %33 = vector.shape_cast %32 : vector<1x4x256xf32> to vector<4x256xf32>
    %34 = vector.shape_cast %26 : vector<4x256xf32> to vector<1x4x256xf32>
    tpu.vector_store %arg6[%c1_23, %c4_24, %c127_25], %34 {strides = array<i32>} : memref<2x12x401xf32, #tpu.memory_space<vmem>>, vector<1x4x256xf32>,
    %35 = vector.broadcast %5 : vector<1x256xf32> to vector<4x256xf32>
    %36 = arith.mulf %26, %35 : vector<4x256xf32>
    %c1_26 = arith.constant 1 : index
    %c8_27 = arith.constant 8 : index
    %c126_28 = arith.constant 126 : index
    %37 = vector.load %arg6[%c1_26, %c8_27, %c126_28] : memref<2x12x401xf32, #tpu.memory_space<vmem>>, vector<1x4x256xf32>
    %38 = vector.shape_cast %37 : vector<1x4x256xf32> to vector<4x256xf32>
    %39 = vector.shape_cast %36 : vector<4x256xf32> to vector<1x4x256xf32>
    tpu.vector_store %arg6[%c1_26, %c8_27, %c126_28], %39 {strides = array<i32>} : memref<2x12x401xf32, #tpu.memory_space<vmem>>, vector<1x4x256xf32>,
    %cst_29 = arith.constant 0.000000e+00 : f32
    %40 = vector.broadcast %cst_29 : f32 to vector<8x256xf32>
    %c0_30 = arith.constant 0 : index
    %c0_31 = arith.constant 0 : index
    %c111 = arith.constant 111 : index
    %41 = vector.load %arg6[%c0_30, %c0_31, %c111] : memref<2x12x401xf32, #tpu.memory_space<vmem>>, vector<1x12x256xf32>
    %42 = vector.shape_cast %41 : vector<1x12x256xf32> to vector<12x256xf32>
    %c0_32 = arith.constant 0 : index
    %c0_33 = arith.constant 0 : index
    %c0_34 = arith.constant 0 : index
    %43 = vector.load %arg3[%c0_32, %c0_33, %c0_34] : memref<3x8x12xf32, #tpu.memory_space<vmem>>, vector<1x8x12xf32>
    %44 = vector.shape_cast %43 : vector<1x8x12xf32> to vector<8x12xf32>
    %cst_35 = arith.constant dense<0.000000e+00> : vector<8x256xf32>
    %45 = tpu.matmul %44, %42, %cst_35 {dimension_numbers = #tpu.dot_dimension_numbers<[1], [0], [0], [1], [0, 0, 1, 1], [], []>} : vector<8x12xf32>, vector<12x256xf32>, vector<8x256xf32> -> vector<8x256xf32>
    %46 = arith.addf %40, %45 : vector<8x256xf32>
    %c0_36 = arith.constant 0 : index
    %c0_37 = arith.constant 0 : index
    %c127_38 = arith.constant 127 : index
    %47 = vector.load %arg6[%c0_36, %c0_37, %c127_38] : memref<2x12x401xf32, #tpu.memory_space<vmem>>, vector<1x12x256xf32>
    %48 = vector.shape_cast %47 : vector<1x12x256xf32> to vector<12x256xf32>
    %c1_39 = arith.constant 1 : index
    %c0_40 = arith.constant 0 : index
    %c0_41 = arith.constant 0 : index
    %49 = vector.load %arg3[%c1_39, %c0_40, %c0_41] : memref<3x8x12xf32, #tpu.memory_space<vmem>>, vector<1x8x12xf32>
    %50 = vector.shape_cast %49 : vector<1x8x12xf32> to vector<8x12xf32>
    %cst_42 = arith.constant dense<0.000000e+00> : vector<8x256xf32>
    %51 = tpu.matmul %50, %48, %cst_42 {dimension_numbers = #tpu.dot_dimension_numbers<[1], [0], [0], [1], [0, 0, 1, 1], [], []>} : vector<8x12xf32>, vector<12x256xf32>, vector<8x256xf32> -> vector<8x256xf32>
    %52 = arith.addf %46, %51 : vector<8x256xf32>
    %c0_43 = arith.constant 0 : index
    %c0_44 = arith.constant 0 : index
    %c143 = arith.constant 143 : index
    %53 = vector.load %arg6[%c0_43, %c0_44, %c143] : memref<2x12x401xf32, #tpu.memory_space<vmem>>, vector<1x12x256xf32>
    %54 = vector.shape_cast %53 : vector<1x12x256xf32> to vector<12x256xf32>
    %c2 = arith.constant 2 : index
    %c0_45 = arith.constant 0 : index
    %c0_46 = arith.constant 0 : index
    %55 = vector.load %arg3[%c2, %c0_45, %c0_46] : memref<3x8x12xf32, #tpu.memory_space<vmem>>, vector<1x8x12xf32>
    %56 = vector.shape_cast %55 : vector<1x8x12xf32> to vector<8x12xf32>
    %cst_47 = arith.constant dense<0.000000e+00> : vector<8x256xf32>
    %57 = tpu.matmul %56, %54, %cst_47 {dimension_numbers = #tpu.dot_dimension_numbers<[1], [0], [0], [1], [0, 0, 1, 1], [], []>} : vector<8x12xf32>, vector<12x256xf32>, vector<8x256xf32> -> vector<8x256xf32>
    %58 = arith.addf %52, %57 : vector<8x256xf32>
    %cst_48 = arith.constant 0.000000e+00 : f32
    %59 = vector.broadcast %cst_48 : f32 to vector<8x256xf32>
    %60 = arith.maximumf %58, %59 : vector<8x256xf32>
    %c0_49 = arith.constant 0 : index
    %c0_50 = arith.constant 0 : index
    %61 = vector.load %arg7[%c0_49, %c0_50] : memref<8x512xf32, #tpu.memory_space<vmem>>, vector<8x256xf32>
    tpu.vector_store %arg7[%c0_49, %c0_50], %60 {strides = array<i32>} : memref<8x512xf32, #tpu.memory_space<vmem>>, vector<8x256xf32>,
    %cst_51 = arith.constant 0.000000e+00 : f32
    %62 = vector.broadcast %cst_51 : f32 to vector<8x256xf32>
    %c1_52 = arith.constant 1 : index
    %c0_53 = arith.constant 0 : index
    %c111_54 = arith.constant 111 : index
    %63 = vector.load %arg6[%c1_52, %c0_53, %c111_54] : memref<2x12x401xf32, #tpu.memory_space<vmem>>, vector<1x12x256xf32>
    %64 = vector.shape_cast %63 : vector<1x12x256xf32> to vector<12x256xf32>
    %c0_55 = arith.constant 0 : index
    %c0_56 = arith.constant 0 : index
    %c0_57 = arith.constant 0 : index
    %65 = vector.load %arg3[%c0_55, %c0_56, %c0_57] : memref<3x8x12xf32, #tpu.memory_space<vmem>>, vector<1x8x12xf32>
    %66 = vector.shape_cast %65 : vector<1x8x12xf32> to vector<8x12xf32>
    %cst_58 = arith.constant dense<0.000000e+00> : vector<8x256xf32>
    %67 = tpu.matmul %66, %64, %cst_58 {dimension_numbers = #tpu.dot_dimension_numbers<[1], [0], [0], [1], [0, 0, 1, 1], [], []>} : vector<8x12xf32>, vector<12x256xf32>, vector<8x256xf32> -> vector<8x256xf32>
    %68 = arith.addf %62, %67 : vector<8x256xf32>
    %c1_59 = arith.constant 1 : index
    %c0_60 = arith.constant 0 : index
    %c127_61 = arith.constant 127 : index
    %69 = vector.load %arg6[%c1_59, %c0_60, %c127_61] : memref<2x12x401xf32, #tpu.memory_space<vmem>>, vector<1x12x256xf32>
    %70 = vector.shape_cast %69 : vector<1x12x256xf32> to vector<12x256xf32>
    %c1_62 = arith.constant 1 : index
    %c0_63 = arith.constant 0 : index
    %c0_64 = arith.constant 0 : index
    %71 = vector.load %arg3[%c1_62, %c0_63, %c0_64] : memref<3x8x12xf32, #tpu.memory_space<vmem>>, vector<1x8x12xf32>
    %72 = vector.shape_cast %71 : vector<1x8x12xf32> to vector<8x12xf32>
    %cst_65 = arith.constant dense<0.000000e+00> : vector<8x256xf32>
    %73 = tpu.matmul %72, %70, %cst_65 {dimension_numbers = #tpu.dot_dimension_numbers<[1], [0], [0], [1], [0, 0, 1, 1], [], []>} : vector<8x12xf32>, vector<12x256xf32>, vector<8x256xf32> -> vector<8x256xf32>
    %74 = arith.addf %68, %73 : vector<8x256xf32>
    %c1_66 = arith.constant 1 : index
    %c0_67 = arith.constant 0 : index
    %c143_68 = arith.constant 143 : index
    %75 = vector.load %arg6[%c1_66, %c0_67, %c143_68] : memref<2x12x401xf32, #tpu.memory_space<vmem>>, vector<1x12x256xf32>
    %76 = vector.shape_cast %75 : vector<1x12x256xf32> to vector<12x256xf32>
    %c2_69 = arith.constant 2 : index
    %c0_70 = arith.constant 0 : index
    %c0_71 = arith.constant 0 : index
    %77 = vector.load %arg3[%c2_69, %c0_70, %c0_71] : memref<3x8x12xf32, #tpu.memory_space<vmem>>, vector<1x8x12xf32>
    %78 = vector.shape_cast %77 : vector<1x8x12xf32> to vector<8x12xf32>
    %cst_72 = arith.constant dense<0.000000e+00> : vector<8x256xf32>
    %79 = tpu.matmul %78, %76, %cst_72 {dimension_numbers = #tpu.dot_dimension_numbers<[1], [0], [0], [1], [0, 0, 1, 1], [], []>} : vector<8x12xf32>, vector<12x256xf32>, vector<8x256xf32> -> vector<8x256xf32>
    %80 = arith.addf %74, %79 : vector<8x256xf32>
    %cst_73 = arith.constant 0.000000e+00 : f32
    %81 = vector.broadcast %cst_73 : f32 to vector<8x256xf32>
    %82 = arith.maximumf %80, %81 : vector<8x256xf32>
    %c0_74 = arith.constant 0 : index
    %c256 = arith.constant 256 : index
    %83 = vector.load %arg7[%c0_74, %c256] : memref<8x512xf32, #tpu.memory_space<vmem>>, vector<8x256xf32>
    tpu.vector_store %arg7[%c0_74, %c256], %82 {strides = array<i32>} : memref<8x512xf32, #tpu.memory_space<vmem>>, vector<8x256xf32>,
    %c0_75 = arith.constant 0 : index
    %c0_76 = arith.constant 0 : index
    %84 = vector.load %arg4[%c0_75, %c0_76] : memref<4x8xf32, #tpu.memory_space<vmem>>, vector<4x8xf32>
    %c0_77 = arith.constant 0 : index
    %c0_78 = arith.constant 0 : index
    %85 = vector.load %arg7[%c0_77, %c0_78] : memref<8x512xf32, #tpu.memory_space<vmem>>, vector<8x512xf32>
    %cst_79 = arith.constant dense<0.000000e+00> : vector<4x512xf32>
    %86 = tpu.matmul %84, %85, %cst_79 {dimension_numbers = #tpu.dot_dimension_numbers<[1], [0], [0], [1], [0, 0, 1, 1], [], []>} : vector<4x8xf32>, vector<8x512xf32>, vector<4x512xf32> -> vector<4x512xf32>
    %c0_80 = arith.constant 0 : index
    %c0_81 = arith.constant 0 : index
    %c0_82 = arith.constant 0 : index
    %87 = vector.load %arg1[%c0_80, %c0_81, %c0_82] : memref<2x4x256xf32, #tpu.memory_space<vmem>>, vector<1x4x256xf32>
    %88 = vector.shape_cast %87 : vector<1x4x256xf32> to vector<4x256xf32>
    %89 = vector.extract_strided_slice %86 {offsets = [0, 0], sizes = [4, 256], strides = [1, 1]} : vector<4x512xf32> to vector<4x256xf32>
    %90 = arith.addf %88, %89 : vector<4x256xf32>
    %c0_83 = arith.constant 0 : index
    %c0_84 = arith.constant 0 : index
    %c0_85 = arith.constant 0 : index
    %91 = vector.load %arg5[%c0_83, %c0_84, %c0_85] : memref<2x4x256xf32, #tpu.memory_space<vmem>>, vector<1x4x256xf32>
    %92 = vector.shape_cast %91 : vector<1x4x256xf32> to vector<4x256xf32>
    %93 = vector.shape_cast %90 : vector<4x256xf32> to vector<1x4x256xf32>
    tpu.vector_store %arg5[%c0_83, %c0_84, %c0_85], %93 {strides = array<i32>} : memref<2x4x256xf32, #tpu.memory_space<vmem>>, vector<1x4x256xf32>,
    %c1_86 = arith.constant 1 : index
    %c0_87 = arith.constant 0 : index
    %c0_88 = arith.constant 0 : index
    %94 = vector.load %arg1[%c1_86, %c0_87, %c0_88] : memref<2x4x256xf32, #tpu.memory_space<vmem>>, vector<1x4x256xf32>
    %95 = vector.shape_cast %94 : vector<1x4x256xf32> to vector<4x256xf32>
    %96 = vector.extract_strided_slice %86 {offsets = [0, 256], sizes = [4, 256], strides = [1, 1]} : vector<4x512xf32> to vector<4x256xf32>
    %97 = arith.addf %95, %96 : vector<4x256xf32>
    %c1_89 = arith.constant 1 : index
    %c0_90 = arith.constant 0 : index
    %c0_91 = arith.constant 0 : index
    %98 = vector.load %arg5[%c1_89, %c0_90, %c0_91] : memref<2x4x256xf32, #tpu.memory_space<vmem>>, vector<1x4x256xf32>
    %99 = vector.shape_cast %98 : vector<1x4x256xf32> to vector<4x256xf32>
    %100 = vector.shape_cast %97 : vector<4x256xf32> to vector<1x4x256xf32>
    tpu.vector_store %arg5[%c1_89, %c0_90, %c0_91], %100 {strides = array<i32>} : memref<2x4x256xf32, #tpu.memory_space<vmem>>, vector<1x4x256xf32>,
    return
  }
  func.func @transform_0(%arg0: i32) -> (i32, i32, i32) {
    %c0_i32 = arith.constant 0 : i32
    %c0_i32_0 = arith.constant 0 : i32
    %c0_i32_1 = arith.constant 0 : i32
    return %arg0, %c0_i32, %c0_i32_0 : i32, i32, i32
  }
  func.func @transform_1(%arg0: i32) -> (i32, i32) {
    %c0_i32 = arith.constant 0 : i32
    %c0_i32_0 = arith.constant 0 : i32
    %c0_i32_1 = arith.constant 0 : i32
    return %c0_i32, %c0_i32_0 : i32, i32
  }
  func.func @transform_2(%arg0: i32) -> (i32, i32, i32) {
    %c0_i32 = arith.constant 0 : i32
    %c0_i32_0 = arith.constant 0 : i32
    %c0_i32_1 = arith.constant 0 : i32
    %c0_i32_2 = arith.constant 0 : i32
    return %c0_i32, %c0_i32_0, %c0_i32_1 : i32, i32, i32
  }
  func.func @transform_3(%arg0: i32) -> (i32, i32) {
    %c0_i32 = arith.constant 0 : i32
    %c0_i32_0 = arith.constant 0 : i32
    %c0_i32_1 = arith.constant 0 : i32
    return %c0_i32, %c0_i32_0 : i32, i32
  }
  func.func @transform_4(%arg0: i32) -> (i32, i32, i32) {
    %c0_i32 = arith.constant 0 : i32
    %c0_i32_0 = arith.constant 0 : i32
    %c0_i32_1 = arith.constant 0 : i32
    return %arg0, %c0_i32, %c0_i32_0 : i32, i32, i32
  }
}

</mosaic_0001>

<bundles_post_ra>
// kernel: tpu_custom_call.1
= control target key start
LH: loop header
LB: loop body
LE: loop exit
PB: predicated region body
PF: predicated region fallthrough
CT: control target
= control target key end

     0   :  { %9 = vsyncpa [#allocation5], 0  ;;  %s1325_s0 = inlined_call_operand.hbm [shape: f32[2,4,256], index: 0, kind: input, shape index: {}]   ;;  %s1326_s1 = inlined_call_operand.hbm [shape: f32[2,256], index: 1, kind: input, shape index: {}]   ;;  %s1327_s2 = inlined_call_operand.hbm [shape: f32[3,8,12], index: 2, kind: input, shape index: {}]   ;;  %s1328_s3 = inlined_call_operand.vmem [shape: f32[4,8], index: 3, kind: input, shape index: {}]   ;;  %s1329_s4 = inlined_call_operand.hbm [shape: f32[2,4,256], index: 4, kind: output, shape index: {}]  }
   0x1   :  { %10 = vsyncpa [#allocation8], 0 }
   0x2   :  { %11 = vsyncpa [#allocation6], 0  ;;  %s1125_s15 = smov [#allocation7]   ;;  %s1126_s17 = smov [#allocation4]  }
   0x3   :  { %s30_s16 = sshll.u32 %s1125_s15, 4  ;;  %s17_s18 = sshll.u32 %s1126_s17, 4  ;;  %s31_s16 = int_to_ptr.vmem [resolvable:$true] %s30_s16  ;;  %s18_s18 = int_to_ptr.vmem [resolvable:$true] %s17_s18 }
   0x4   :  { %s1047_s19 = scalar_lea.vmem %s31_s16, 64  ;;  %p1052_p1 = scmp.lt.s32.totalorder %s31_s16, %s31_s16 }
   0x5   :  { %p1048_p0 = scmp.ne.s32.totalorder %s31_s16, %s1047_s19  ;;  %p1053_p2 = scmp.lt.s32.totalorder %s1047_s19, %s1047_s19 }
   0x7   :  { %p1054_p3 = por %p1053_p2, %p1052_p1 }
   0x9   :  { %p1055_p4 = pnand %p1054_p3, %p1048_p0 }
   0xb   :  { %1058 = shalt.err (!%p1055_p4)
}
   0xc   :  { %33 = dma.hbm_to_vmem [thread:$0]  %s1326_s1, 64, %s31_s16, [#allocation8]  }
   0xd   :  { %s1067_s22 = scalar_lea.vmem %s18_s18, 256  ;;  %p1072_p6 = scmp.lt.s32.totalorder %s18_s18, %s18_s18 }
   0xe   :  { %p1068_p5 = scmp.ne.s32.totalorder %s18_s18, %s1067_s22  ;;  %p1073_p7 = scmp.lt.s32.totalorder %s1067_s22, %s1067_s22 }
  0x10   :  { %p1074_p8 = por %p1073_p7, %p1072_p6 }
  0x12   :  { %p1075_p9 = pnand %p1074_p8, %p1068_p5 }
  0x14   :  { %1078 = shalt.err (!%p1075_p9)
}
  0x15   :  { %s1127_s23 = smov 128   ;;  %s1128_s24 = smov 8  }
  0x16   :  { %23 = dma.hbm_to_vmem [thread:$0]  %s1325_s0, 256, %s18_s18, [#allocation5], %s1127_s23, %s1127_s23, %s1128_s24  }
  0x17   :  { %s1129_s27 = smov [#allocation9]  }
  0x18   :  { %s39_s28 = sshll.u32 %s1129_s27, 4  ;;  %s40_s28 = int_to_ptr.vmem [resolvable:$true] %s39_s28 }
  0x19   :  { %s1087_s1 = scalar_lea.vmem %s40_s28, 384  ;;  %p1092_p11 = scmp.lt.s32.totalorder %s40_s28, %s40_s28 }
  0x1a   :  { %p1088_p10 = scmp.ne.s32.totalorder %s40_s28, %s1087_s1  ;;  %p1093_p12 = scmp.lt.s32.totalorder %s1087_s1, %s1087_s1 }
  0x1c   :  { %p1094_p13 = por %p1093_p12, %p1092_p11 }
  0x1e   :  { %p1095_p0 = pnand %p1094_p13, %p1088_p10 }
  0x20   :  { %1098 = shalt.err (!%p1095_p0)
}
  0x21   :  { %45 = dma.hbm_to_vmem [thread:$0]  %s1327_s2, 384, %s40_s28, [#allocation8], %s1127_s23, %s1127_s23, %s1128_s24  }
  0x22   :  { %1119 = dma.done.wait [#allocation5], 256  }
  0x23   :  { %1120 = vsyncadd [#allocation5], 4294967040 }
  0x24   :  { %1121 = dma.done.wait [#allocation8], 448  }
  0x25   :  { %1122 = vsyncadd [#allocation8], 4294966848  ;;  %v79_v0 = vlaneseq  ;;  %vm67_vm0 = vcmask 134144   ;;  %v1130_v1 = vmov 0.0   ;;  %vm61_vm1 = vcmask 1048560   ;;  %v1195_v5 = vld [vmem:[#allocation4] sm:$0xff] }
  0x26   :  { %68 = vst.msk [vmem:[#allocation2 + $0x38] sm:$0xf] %vm67_vm0, %v1130_v1  ;;  %57 = vst [vmem:[#allocation2] sm:$0xff] %v1130_v1  ;;  %vm63_vm2 = vcmask 138240   ;;  %282 = vmatprep.mubr.f32.mxu0 %v1130_v1  ;;  %378 = vmatprep.mubr.f32.mxu1 %v1130_v1  ;;  %vm65_vm3 = vcmask 1044464   ;;  %v1197_v7 = vld [vmem:[#allocation4 + $0x8] sm:$0xff] }
  0x27   :  { %58 = vst [vmem:[#allocation2 + $0x20] sm:$0xf] %v1130_v1  ;;  %59 = vst [vmem:[#allocation2 + $0x40] sm:$0xff] %v1130_v1  ;;  %v80_v2 = vshrl.u32 %v79_v0, 7  ;;  %v77_v8 = vmax.f32 %v1195_v5, 0.0  ;;  %v140_v11 = vmax.f32 %v1197_v7, 0.0 }
  0x28   :  { %60 = vst [vmem:[#allocation2 + $0x60] sm:$0xf] %v1130_v1  ;;  %72 = vst.msk [vmem:[#allocation2 + $0x78] sm:$0xf] %vm67_vm0, %v1130_v1  ;;  %s1131_s0 = smov 127   ;;  %s1132_s2 = smov 126  }
  0x29   :  { %62 = vst.msk [vmem:[#allocation2 + $0x10] sm:$0xff] %vm61_vm1, %v1130_v1  ;;  %69 = vst.msk [vmem:[#allocation2 + $0x50] sm:$0xff] %vm61_vm1, %v1130_v1  ;;  %v81_v3 = vsub.s32 0, %v80_v2  ;;  %v85_v4 = vsub.s32 1, %v80_v2  ;;  %99 = vrot.lane.b32.xlu1 %v77_v8, %s1131_s0  ;;  %v96_v15 = vcombine.low %v77_v8, %v77_v8  ;;  %v149_v26 = vcombine.low %v140_v11, %v140_v11  ;;  %s1133_s5 = smov 113   ;;  %s1134_s6 = smov 1  }
  0x2a   :  { %64 = vst.msk [vmem:[#allocation2 + $0x18] sm:$0xff] %vm63_vm2, %v1130_v1  ;;  %70 = vst.msk [vmem:[#allocation2 + $0x58] sm:$0xff] %vm63_vm2, %v1130_v1  ;;  %v75_v6 = vld [vmem:[#allocation7 + $0x1] ss:$2 sm:$0x3]  ;;  %vm109_vm4 = vcmask 1039364  }
  0x2b   :  { %66 = vst.msk [vmem:[#allocation2 + $0x30] sm:$0xf] %vm65_vm3, %v1130_v1  ;;  %71 = vst.msk [vmem:[#allocation2 + $0x70] sm:$0xf] %vm65_vm3, %v1130_v1  ;;  %v115_v9 = vrot.slane %v75_v6, %v81_v3  ;;  %v119_v10 = vrot.slane %v75_v6, %v85_v4  ;;  %vm101_vm5 = vcmask 1039360   ;;  %vm106_vm6 = vcmask 1048572  }
  0x2c   :  { %v73_v12 = vld [vmem:[#allocation7] ss:$2 sm:$0x3]  ;;  %vm136_vm7 = vcmask 1027072   ;;  %vm129_vm8 = vcmask 1031168   ;;  %s1135_s7 = smov 17  }
  0x2d   :  { %v82_v13 = vrot.slane %v73_v12, %v81_v3  ;;  %v86_v14 = vrot.slane %v73_v12, %v85_v4  ;;  %v120_v16 = vcombine.low %v115_v9, %v119_v10  ;;  %97 = vrot.lane.b32.xlu1 %v96_v15, %s1131_s0  ;;  %v390_v27 = vld [vmem:[#allocation2 + $0x38] sm:$0xf]  ;;  %vm213_vm9 = vcmask 1043456  }
  0x2e   :  { %vm202_vm10 = vcmask 7168   ;;  %vm209_vm11 = vcmask 97280   ;;  %vm411_vm12 = vcmask 924672   ;;  %vm828_vm13 = vcmask 64512  }
  0x2f   :  { %v87_v17 = vcombine.low %v82_v13, %v86_v14  ;;  %v122_v18 = vmul.f32 %v120_v16, %v77_v8  ;;  %v161_v19 = vmul.f32 %v140_v11, %v120_v16  ;;  %v713_v29 = vld [vmem:[#allocation2 + $0x78] sm:$0xf] }
  0x31   :  { %v89_v20 = vmul.f32 %v87_v17, %v77_v8  ;;  %v141_v21 = vmul.f32 %v140_v11, %v87_v17  ;;  %125 = vrot.lane.b32.xlu0 %v122_v18, %s1132_s2  ;;  %v124_v22 = vcombine.high %v122_v18, %v122_v18  ;;  %v163_v23 = vcombine.high %v161_v19, %v161_v19  ;;  %v387_v28 = vld [vmem:[#allocation2 + $0x18] sm:$0xff] }
  0x32   :  { %v710_v57 = vld [vmem:[#allocation2 + $0x58] sm:$0xff] }
  0x33   :  { %93 = vst [vmem:[#allocation2 + $0x8] sm:$0xf] %v89_v20  ;;  %146 = vst [vmem:[#allocation2 + $0x48] sm:$0xf] %v141_v21  ;;  %v91_v24 = vcombine.high %v89_v20, %v89_v20  ;;  %v143_v25 = vcombine.high %v141_v21, %v141_v21  ;;  %166 = vrot.lane.b32.xlu1 %v163_v23, %s1132_s2 }
  0x35   :  { %94 = vst [vmem:[#allocation2 + $0x10] sm:$0xf] %v91_v24  ;;  %147 = vst [vmem:[#allocation2 + $0x50] sm:$0xf] %v143_v25  ;;  %127 = vrot.lane.b32.xlu0 %v124_v22, %s1132_s2 }
  0x37   :  { %152 = vrot.lane.b32.xlu1 %v140_v11, %s1131_s0 }
  0x39   :  { %164 = vrot.lane.b32.xlu0 %v161_v19, %s1132_s2 }
  0x3d   :  { %150 = vrot.lane.b32.xlu0 %v149_v26, %s1131_s0 }
  0x41   :  { %409 = vrot.lane.b32.xlu0 %v390_v27, %s1133_s5 }
  0x45   :  { %403 = vrot.lane.b32.xlu0 %v387_v28, %s1133_s5  ;;  %v183_v28 = vld [vmem:[#allocation9 + $0x8] sm:$0xff] }
  0x49   :  { %731 = vrot.lane.b32.xlu0 %v713_v29, %s1133_s5 }
  0x9b   :  { %v100_v30 = vpop.permute.xlu1 %99 }
  0x9c   :  { %110 = vst.msk [vmem:[#allocation2 + $0x10] sm:$0xf0] %vm109_vm4, %v100_v30 }
  0x9f   :  { %v98_v31 = vpop.permute.xlu1 %97 }
  0xa0   :  { %v102_v33 = vsel %vm101_vm5, %v98_v31, %v100_v30  ;;  %107 = vst.msk [vmem:[#allocation2] sm:$0xf0] %vm106_vm6, %v98_v31 }
  0xa1   :  { %108 = vst [vmem:[#allocation2 + $0x8] sm:$0xf0] %v102_v33 }
  0xa3   :  { %v126_v32 = vpop.permute.xlu0 %125  ;;  %v386_v36 = vld [vmem:[#allocation2 + $0x10] sm:$0xff] }
  0xa4   :  { %134 = vst.msk [vmem:[#allocation2 + $0x20] sm:$0xf] %vm65_vm3, %v126_v32  ;;  %401 = vrot.lane.b32.xlu1 %v386_v36, %s1133_s5  ;;  %194 = vrot.lane.b32.xlu0 %v386_v36, %s1134_s6 }
  0xa5   :  { %v167_v34 = vpop.permute.xlu1 %166 }
  0xa6   :  { %174 = vst.msk [vmem:[#allocation2 + $0x70] sm:$0xf] %vm136_vm7, %v167_v34 }
  0xa7   :  { %v128_v35 = vpop.permute.xlu0 %127  ;;  %v175_v40 = vld [vmem:[#allocation2] sm:$0xff] }
  0xa8   :  { %v130_v37 = vsel %vm129_vm8, %v126_v32, %v128_v35  ;;  %137 = vst.msk [vmem:[#allocation2 + $0x30] sm:$0xf] %vm136_vm7, %v128_v35  ;;  %293 = vrot.lane.b32.xlu0 %v386_v36, %s1135_s7  ;;  %190 = vrot.lane.b32.xlu1 %v175_v40, %s1134_s6  ;;  %v176_v47 = vld [vmem:[#allocation2 + $0x8] sm:$0xff] }
  0xa9   :  { %135 = vst [vmem:[#allocation2 + $0x28] sm:$0xf] %v130_v37  ;;  %v153_v38 = vpop.permute.xlu1 %152  ;;  %v392_v35 = vld [vmem:[#allocation9 + $0x10] sm:$0xff] }
  0xaa   :  { %160 = vst.msk [vmem:[#allocation2 + $0x50] sm:$0xf0] %vm109_vm4, %v153_v38 }
  0xab   :  { %v165_v39 = vpop.permute.xlu0 %164  ;;  %v178_v46 = vld [vmem:[#allocation2 + $0x20] sm:$0xf] }
  0xac   :  { %v168_v41 = vsel %vm129_vm8, %v165_v39, %v167_v34  ;;  %172 = vst.msk [vmem:[#allocation2 + $0x60] sm:$0xf] %vm65_vm3, %v165_v39  ;;  %289 = vrot.lane.b32.xlu1 %v175_v40, %s1135_s7 }
  0xad   :  { %173 = vst [vmem:[#allocation2 + $0x68] sm:$0xf] %v168_v41  ;;  %v507_v51 = vld [vmem:[#allocation2 + $0x70] sm:$0xf]  ;;  %v181_v41 = vld [vmem:[#allocation9] sm:$0xff] }
  0xae   :  { %v712_v55 = vld [vmem:[#allocation2 + $0x70] sm:$0xf] }
  0xaf   :  { %v151_v42 = vpop.permute.xlu0 %150  ;;  %v180_v49 = vld [vmem:[#allocation2 + $0x30] sm:$0xf] }
  0xb0   :  { %v154_v43 = vsel %vm101_vm5, %v151_v42, %v153_v38  ;;  %158 = vst.msk [vmem:[#allocation2 + $0x40] sm:$0xf0] %vm106_vm6, %v151_v42  ;;  %v179_v52 = vld [vmem:[#allocation2 + $0x28] sm:$0xf]  ;;  %v389_v53 = vld [vmem:[#allocation2 + $0x30] sm:$0xf] }
  0xb1   :  { %159 = vst [vmem:[#allocation2 + $0x48] sm:$0xf0] %v154_v43  ;;  %v504_v44 = vld [vmem:[#allocation2 + $0x50] sm:$0xff]  ;;  %v388_v54 = vld [vmem:[#allocation2 + $0x28] sm:$0xf] }
  0xb2   :  { %520 = vrot.lane.b32.xlu0 %v504_v44, %s1134_s6 }
  0xb3   :  { %v505_v48 = vld [vmem:[#allocation2 + $0x60] sm:$0xf]  ;;  %v410_v59 = vpop.permute.xlu0 %409 }
  0xb4   :  { %v711_v56 = vld [vmem:[#allocation2 + $0x68] sm:$0xf] }
  0xb5   :  { %v506_v58 = vld [vmem:[#allocation2 + $0x68] sm:$0xf] }
  0xb6   :  { %616 = vrot.lane.b32.xlu0 %v504_v44, %s1135_s7 }
  0xb7   :  { %v502_v45 = vld [vmem:[#allocation2 + $0x40] sm:$0xff]  ;;  %v404_v60 = vpop.permute.xlu0 %403 }
  0xb8   :  { %516 = vrot.lane.b32.xlu1 %v502_v45, %s1134_s6  ;;  %v503_v50 = vld [vmem:[#allocation2 + $0x48] sm:$0xff] }
  0xba   :  { %196 = vrot.lane.b32.xlu0 %v178_v46, %s1134_s6 }
  0xbb   :  { %v1245_v61 = vpop.permute.xlu0 %731 }
  0xbc   :  { %612 = vrot.lane.b32.xlu1 %v502_v45, %s1135_s7 }
  0xbe   :  { %295 = vrot.lane.b32.xlu0 %v178_v46, %s1135_s7 }
  0xc0   :  { %192 = vrot.lane.b32.xlu1 %v176_v47, %s1134_s6 }
  0xc2   :  { %522 = vrot.lane.b32.xlu0 %v505_v48, %s1134_s6 }
  0xc4   :  { %291 = vrot.lane.b32.xlu1 %v176_v47, %s1135_s7 }
  0xc6   :  { %618 = vrot.lane.b32.xlu0 %v505_v48, %s1135_s7 }
  0xc8   :  { %399 = vrot.lane.b32.xlu1 %v176_v47, %s1133_s5 }
  0xca   :  { %299 = vrot.lane.b32.xlu0 %v180_v49, %s1135_s7 }
  0xcc   :  { %518 = vrot.lane.b32.xlu1 %v503_v50, %s1134_s6 }
  0xce   :  { %526 = vrot.lane.b32.xlu0 %v507_v51, %s1134_s6 }
  0xd0   :  { %614 = vrot.lane.b32.xlu1 %v503_v50, %s1135_s7 }
  0xd2   :  { %622 = vrot.lane.b32.xlu0 %v507_v51, %s1135_s7 }
  0xd4   :  { %200 = vrot.lane.b32.xlu1 %v180_v49, %s1134_s6 }
  0xd6   :  { %198 = vrot.lane.b32.xlu0 %v179_v52, %s1134_s6 }
  0xd8   :  { %407 = vrot.lane.b32.xlu1 %v389_v53, %s1133_s5 }
  0xda   :  { %405 = vrot.lane.b32.xlu0 %v388_v54, %s1133_s5 }
  0xdc   :  { %729 = vrot.lane.b32.xlu1 %v712_v55, %s1133_s5 }
  0xde   :  { %727 = vrot.lane.b32.xlu0 %v711_v56, %s1133_s5 }
  0xe0   :  { %297 = vrot.lane.b32.xlu1 %v179_v52, %s1135_s7 }
  0xe2   :  { %725 = vrot.lane.b32.xlu0 %v710_v57, %s1133_s5 }
  0xe4   :  { %524 = vrot.lane.b32.xlu1 %v506_v58, %s1134_s6 }
  0xe8   :  { %620 = vrot.lane.b32.xlu1 %v506_v58, %s1135_s7 }
  0xec   :  { %723 = vrot.lane.b32.xlu1 %v504_v44, %s1133_s5 }
  0xf0   :  { %721 = vrot.lane.b32.xlu1 %v503_v50, %s1133_s5 }
 0x116   :  { %v402_v62 = vpop.permute.xlu1 %401  ;;  %v195_v63 = vpop.permute.xlu0 %194 }
 0x117   :  { %v413_v34 = vsel %vm411_vm12, %v402_v62, %v404_v60 }
 0x11a   :  { %v191_v0 = vpop.permute.xlu1 %190  ;;  %v294_v2 = vpop.permute.xlu0 %293 }
 0x11e   :  { %v290_v3 = vpop.permute.xlu1 %289 }
 0x124   :  { %v1247_v4 = vpop.permute.xlu0 %520 }
 0x128   :  { %v1249_v6 = vpop.permute.xlu0 %616 }
 0x12a   :  { %v1251_v8 = vpop.permute.xlu1 %516 }
 0x12c   :  { %v197_v9 = vpop.permute.xlu0 %196 }
 0x12e   :  { %v1253_v10 = vpop.permute.xlu1 %612 }
 0x130   :  { %v296_v11 = vpop.permute.xlu0 %295 }
 0x132   :  { %v193_v12 = vpop.permute.xlu1 %192 }
 0x133   :  { %v204_v27 = vsel %vm202_vm10, %v193_v12, %v195_v63  ;;  %v203_v31 = vsel %vm202_vm10, %v191_v0, %v193_v12 }
 0x134   :  { %v523_v13 = vpop.permute.xlu0 %522 }
 0x136   :  { %v292_v14 = vpop.permute.xlu1 %291 }
 0x137   :  { %v302_v40 = vsel %vm63_vm2, %v292_v14, %v294_v2  ;;  %v301_v43 = vsel %vm63_vm2, %v290_v3, %v292_v14  ;;  %v823_v14 = vld [vmem:[%s1328_s3] sm:$0xf]  ;;  %s1136_s3 = smov [#allocation10]  }
 0x138   :  { %v619_v15 = vpop.permute.xlu0 %618  ;;  %s994_s10 = sshll.u32 %s1136_s3, 4  ;;  %s995_s10 = int_to_ptr.vmem [resolvable:$true] %s994_s10 }
 0x139   :  { %s1099_s11 = scalar_lea.vmem %s995_s10, 256  ;;  %p1104_p2 = scmp.lt.s32.totalorder %s995_s10, %s995_s10 }
 0x13a   :  { %v400_v16 = vpop.permute.xlu1 %399  ;;  %p1100_p1 = scmp.ne.s32.totalorder %s995_s10, %s1099_s11  ;;  %p1105_p3 = scmp.lt.s32.totalorder %s1099_s11, %s1099_s11 }
 0x13b   :  { %v412_v36 = vsel %vm411_vm12, %v400_v16, %v402_v62 }
 0x13c   :  { %v300_v17 = vpop.permute.xlu0 %299  ;;  %p1106_p4 = por %p1105_p3, %p1104_p2 }
 0x13e   :  { %v519_v18 = vpop.permute.xlu1 %518  ;;  %p1107_p5 = pnand %p1106_p4, %p1100_p1 }
 0x13f   :  { %v529_v47 = vsel %vm202_vm10, %v519_v18, %v1247_v4  ;;  %v528_v48 = vsel %vm202_vm10, %v1251_v8, %v519_v18 }
 0x140   :  { %v527_v19 = vpop.permute.xlu0 %526 }
 0x142   :  { %v1255_v20 = vpop.permute.xlu1 %614 }
 0x143   :  { %v625_v55 = vsel %vm63_vm2, %v1255_v20, %v1249_v6  ;;  %v624_v56 = vsel %vm63_vm2, %v1253_v10, %v1255_v20 }
 0x144   :  { %v623_v21 = vpop.permute.xlu0 %622 }
 0x146   :  { %v201_v22 = vpop.permute.xlu1 %200 }
 0x148   :  { %v199_v23 = vpop.permute.xlu0 %198 }
 0x149   :  { %v206_v25 = vsel %vm202_vm10, %v199_v23, %v201_v22  ;;  %v205_v26 = vsel %vm202_vm10, %v197_v9, %v199_v23 }
 0x14a   :  { %v408_v24 = vpop.permute.xlu1 %407  ;;  %1007 = vmatprep.subr.msk.mxu0 %vm213_vm9, %v206_v25 }
 0x14b   :  { %1008 = vmatpush1.msk.msra.mxu0 %vm213_vm9, %v205_v26  ;;  %v415_v32 = vsel %vm411_vm12, %v408_v24, %v410_v59 }
 0x14c   :  { %v406_v29 = vpop.permute.xlu0 %405  ;;  %248 = vmatprep.subr.mxu0 %v204_v27 }
 0x14d   :  { %v414_v33 = vsel %vm411_vm12, %v406_v29, %v408_v24  ;;  %249 = vmatpush1.msra.mxu0 %v203_v31 }
 0x14e   :  { %v730_v30 = vpop.permute.xlu1 %729  ;;  %1013 = vmatprep.subr.msk.mxu0 %vm213_vm9, %v415_v32  ;;  %1009 = vmatmul.mubr.msk.f32.vlgmr.msra.gmra.mxu0 %vm209_vm11, %v183_v28 }
 0x14f   :  { %1014 = vmatpush1.msk.msra.mxu0 %vm213_vm9, %v414_v33  ;;  %489 = vmatprep.mubr.f32.mxu0 %v1130_v1  ;;  %v736_v50 = vsel %vm411_vm12, %v730_v30, %v1245_v61 }
 0x150   :  { %455 = vmatprep.subr.mxu0 %v413_v34  ;;  %v728_v46 = vpop.permute.xlu0 %727 }
 0x151   :  { %456 = vmatpush1.msra.mxu0 %v412_v36  ;;  %v735_v54 = vsel %vm411_vm12, %v728_v46, %v730_v30 }
 0x152   :  { %v298_v37 = vpop.permute.xlu1 %297  ;;  %1015 = vmatmul.mubr.msk.f32.vlgmr.msra.gmra.mxu0 %vm209_vm11, %v392_v35 }
 0x153   :  { %v304_v38 = vsel %vm63_vm2, %v298_v37, %v300_v17  ;;  %v303_v39 = vsel %vm63_vm2, %v296_v11, %v298_v37  ;;  %701 = vmatprep.mubr.f32.mxu0 %v1130_v1 }
 0x154   :  { %1010 = vmatprep.subr.msk.mxu1 %vm213_vm9, %v304_v38  ;;  %v726_v53 = vpop.permute.xlu0 %725 }
 0x155   :  { %1011 = vmatpush1.msk.msra.mxu1 %vm213_vm9, %v303_v39 }
 0x156   :  { %344 = vmatprep.subr.mxu1 %v302_v40  ;;  %v525_v42 = vpop.permute.xlu1 %524 }
 0x157   :  { %v530_v44 = vsel %vm202_vm10, %v523_v13, %v525_v42  ;;  %v531_v45 = vsel %vm202_vm10, %v525_v42, %v527_v19  ;;  %345 = vmatpush1.msra.mxu1 %v301_v43 }
 0x158   :  { %1012 = vmatmul.mubr.msk.f32.vlgmr.msra.gmra.mxu1 %vm209_vm11, %v181_v41  ;;  %1016 = vmatprep.subr.msk.mxu1 %vm213_vm9, %v531_v45 }
 0x159   :  { %1017 = vmatpush1.msk.msra.mxu1 %vm213_vm9, %v530_v44  ;;  %605 = vmatprep.mubr.f32.mxu1 %v1130_v1 }
 0x15a   :  { %571 = vmatprep.subr.mxu1 %v529_v47  ;;  %v621_v49 = vpop.permute.xlu1 %620 }
 0x15b   :  { %v626_v51 = vsel %vm63_vm2, %v619_v15, %v621_v49  ;;  %v627_v52 = vsel %vm63_vm2, %v621_v49, %v623_v21  ;;  %572 = vmatpush1.msra.mxu1 %v528_v48 }
 0x15c   :  { %1019 = vmatprep.subr.msk.mxu0 %vm213_vm9, %v627_v52  ;;  %1022 = vmatprep.subr.msk.mxu1 %vm213_vm9, %v736_v50 }
 0x15d   :  { %1018 = vmatmul.mubr.msk.f32.vlgmr.msra.gmra.mxu1 %vm209_vm11, %v183_v28  ;;  %1020 = vmatpush1.msk.msra.mxu0 %vm213_vm9, %v626_v51 }
 0x15e   :  { %1023 = vmatpush1.msk.msra.mxu1 %vm213_vm9, %v735_v54  ;;  %667 = vmatprep.subr.mxu0 %v625_v55  ;;  %v724_v57 = vpop.permute.xlu1 %723 }
 0x15f   :  { %668 = vmatpush1.msra.mxu0 %v624_v56  ;;  %v734_v58 = vsel %vm411_vm12, %v724_v57, %v726_v53  ;;  %810 = vmatprep.mubr.f32.mxu1 %v1130_v1 }
 0x160   :  { %1021 = vmatmul.mubr.msk.f32.vlgmr.msra.gmra.mxu0 %vm209_vm11, %v181_v41  ;;  %776 = vmatprep.subr.mxu1 %v734_v58 }
 0x161   :  { %896 = vmatprep.mubr.f32.mxu0 %v1130_v1 }
 0x162   :  { %v722_v59 = vpop.permute.xlu1 %721 }
 0x163   :  { %v733_v60 = vsel %vm411_vm12, %v722_v59, %v724_v57 }
 0x164   :  { %777 = vmatpush1.msra.mxu1 %v733_v60 }
 0x165   :  { %1024 = vmatmul.mubr.msk.f32.vlgmr.msra.gmra.mxu1 %vm209_vm11, %v392_v35 }
 0x166   :  { %967 = vmatprep.mubr.f32.mxu1 %v1130_v1 }
 0x20e   :  { %v284_v61 = vpop.f32.mrf.mxu0 }
 0x210   :  { %v286_v62 = vpop.f32.mrf.mxu0 }
 0x212   :  { %v491_v63 = vpop.f32.mrf.mxu0 }
 0x214   :  { %v493_v4 = vpop.f32.mrf.mxu0 }
 0x218   :  { %v380_v0 = vpop.f32.mrf.mxu1 }
 0x219   :  { %v381_v2 = vadd.f32 %v380_v0, %v284_v61 }
 0x21a   :  { %v382_v3 = vpop.f32.mrf.mxu1 }
 0x21b   :  { %v383_v6 = vadd.f32 %v382_v3, %v286_v62  ;;  %v496_v8 = vadd.f32 %v491_v63, %v381_v2 }
 0x21d   :  { %v497_v9 = vadd.f32 %v493_v4, %v383_v6  ;;  %v498_v10 = vmax.f32 %v496_v8, 0.0  ;;  %v607_v12 = vpop.f32.mrf.mxu1 }
 0x21f   :  { %v499_v11 = vmax.f32 %v497_v9, 0.0  ;;  %v609_v1 = vpop.f32.mrf.mxu1 }
 0x220   :  { %v703_v13 = vpop.f32.mrf.mxu0 }
 0x221   :  { %862 = vmatprep.subr.mxu0 %v499_v11  ;;  %v704_v16 = vadd.f32 %v703_v13, %v607_v12 }
 0x222   :  { %863 = vmatpush1.msra.mxu0 %v498_v10  ;;  %v705_v15 = vpop.f32.mrf.mxu0 }
 0x223   :  { %1025 = vmatmul.mubr.msk.f32.vlgmr.msra.gmra.mxu0 %vm828_vm13, %v823_v14  ;;  %v706_v18 = vadd.f32 %v705_v15, %v609_v1 }
 0x225   :  { %v812_v17 = vpop.f32.mrf.mxu1 }
 0x226   :  { %v817_v19 = vadd.f32 %v812_v17, %v704_v16 }
 0x227   :  { %v814_v20 = vpop.f32.mrf.mxu1 }
 0x228   :  { %v818_v21 = vadd.f32 %v814_v20, %v706_v18  ;;  %v819_v23 = vmax.f32 %v817_v19, 0.0 }
 0x22a   :  { %v820_v22 = vmax.f32 %v818_v21, 0.0 }
 0x22c   :  { %933 = vmatprep.subr.mxu1 %v820_v22 }
 0x22d   :  { %934 = vmatpush1.msra.mxu1 %v819_v23 }
 0x22e   :  { %1026 = vmatmul.mubr.msk.f32.vlgmr.msra.gmra.mxu1 %vm828_vm13, %v823_v14 }
 0x2e3   :  { %v898_v24 = vpop.f32.mrf.mxu0 }
 0x2e5   :  { %v900_v25 = vpop.f32.mrf.mxu0 }
 0x2e6   :  { %v977_v26 = vcombine.low %v898_v24, %v900_v25 }
 0x2e8   :  { %v979_v27 = vadd.f32 %v977_v26, %v1195_v5 }
 0x2ea   :  { %980 = vst [vmem:[#allocation10] sm:$0xff] %v979_v27 }
 0x2ee   :  { %v969_v28 = vpop.f32.mrf.mxu1 }
 0x2f0   :  { %v971_v29 = vpop.f32.mrf.mxu1 }
 0x2f1   :  { %v984_v30 = vcombine.low %v969_v28, %v971_v29 }
 0x2f3   :  { %v986_v31 = vadd.f32 %v984_v30, %v1197_v7 }
 0x2f5   :  { %988 = vst [vmem:[#allocation10 + $0x8] sm:$0xff] %v986_v31 }
 0x2f6   :  { %1110 = shalt.err (!%p1107_p5)
}
 0x2f7   :  { %1000 = dma.vmem_to_hbm [thread:$0]  %s995_s10, 256, %s1329_s4, [#allocation6], %s1127_s23, %s1127_s23, %s1128_s24  }
 0x2f8   :  { %1123 = dma.done.wait [#allocation6], 256  }
 0x2f9   :  { %1124 = vsyncadd [#allocation6], 4294967040 }
 0x2fa   :  { %1004 = vsyncpa [#allocation5], 1 }
 0x2fb   :  { %1005 = vsyncpa [#allocation8], 1 }
 0x2fc   :  { %1006 = vsyncpa [#allocation6], 1 }

</bundles_post_ra>
